<compile_context>
chip_gen: v7x
topology: tpu7x:2x2x1
jax: 0.10.0
libtpu: 0.0.40
codegen_flags: <defaults>
</compile_context>

<pallas_src>
import numpy as np
import jax
import jax.numpy as jnp
from jax.experimental import pallas as pl
from jax.experimental.pallas import tpu as pltpu

INPUT_RESOLUTION = 64
POOL_OUT = 3
PAD_W = 128            # lane-padded width used for every inner layer
LAST_OUT = 512

# layer dims: encoder then decoder
LAYER_DIMS = [
    (INPUT_RESOLUTION, 128), (128, 64), (64, 36), (36, 18), (18, 9),   # encoder
    (9, 18), (18, 36), (36, 64), (64, 128), (128, INPUT_RESOLUTION),   # decoder
    (INPUT_RESOLUTION, LAST_OUT),
]
# activation applied AFTER each linear layer
ACTS = ["relu", "relu", "relu", "relu", "none",
        "relu", "relu", "relu", "relu", "relu", "sigmoid"]
NUM_LAYERS = len(LAYER_DIMS)     # 11
NUM_INNER = NUM_LAYERS - 1       # 10 layers packed into the (10, 128, 128) slab


# ---------------------------------------------------------------------------
# Fused kernel: MLP chain + adaptive-avg-pool, one row tile per grid step.
# ---------------------------------------------------------------------------
def fused_kernel(x_ref, w_ref, wlast_ref, b_ref, pmat_ref, dec_ref, pool_ref):
    x = x_ref[...]                                        # (tm, 64) f32

    # ---- AdaptiveAvgPool1d(3) as a single f32 MXU matmul (lane-dense 128-wide
    #      output, padded columns are zero and sliced off in the wrapper).
    pool_ref[...] = jnp.dot(x, pmat_ref[...],
                            preferred_element_type=jnp.float32)

    # ---- encoder/decoder MLP chain: bf16 dots, f32 accumulate/activations.
    b_all = b_ref[...]                                    # (11, 512) f32

    # layer 0: (tm, 64) @ (64, 128)  (slice the real rows out of the padded slab)
    w0 = w_ref[0]                                         # (128, 128) bf16
    h = jnp.dot(x.astype(jnp.bfloat16), w0[:INPUT_RESOLUTION, :],
                preferred_element_type=jnp.float32)
    h = jnp.maximum(h + b_all[0:1, :PAD_W], 0.0)

    # layers 1..9: uniform padded (tm, 128) @ (128, 128); zero-padded weight
    # rows/cols + zero-padded biases keep the padded lanes exactly zero.
    for l in range(1, NUM_INNER):
        h = jnp.dot(h.astype(jnp.bfloat16), w_ref[l],
                    preferred_element_type=jnp.float32)
        h = h + b_all[l:l + 1, :PAD_W]
        if ACTS[l] == "relu":
            h = jnp.maximum(h, 0.0)
        # ACTS[4] == "none": encoder bottleneck output, no activation

    # final layer: (tm, 128) @ (128, 512), sigmoid
    out = jnp.dot(h.astype(jnp.bfloat16), wlast_ref[...],
                  preferred_element_type=jnp.float32)
    dec_ref[...] = jax.nn.sigmoid(out + b_all[NUM_INNER:NUM_INNER + 1, :])


# ---------------------------------------------------------------------------
# Parameter init (deterministic, PyTorch-Linear-style uniform(-1/sqrt(in), .))
# ---------------------------------------------------------------------------
def init_params(key):
    params = []
    for (fan_in, fan_out) in LAYER_DIMS:
        key, kw, kb = jax.random.split(key, 3)
        bound = 1.0 / jnp.sqrt(jnp.float32(fan_in))
        w = jax.random.uniform(kw, (fan_in, fan_out), jnp.float32, -bound, bound)
        b = jax.random.uniform(kb, (fan_out,), jnp.float32, -bound, bound)
        params.append((w, b))
    return params


# ---------------------------------------------------------------------------
# Parameter / constant packing (done once, outside the hot path).
# ---------------------------------------------------------------------------
def pack_params(params):
    w_slab = np.zeros((NUM_INNER, PAD_W, PAD_W), np.float32)
    for l in range(NUM_INNER):
        w, _ = params[l]
        fi, fo = w.shape
        w_slab[l, :fi, :fo] = np.asarray(w)
    w_last = np.zeros((PAD_W, LAST_OUT), np.float32)
    wl = np.asarray(params[NUM_INNER][0])
    w_last[:wl.shape[0], :] = wl
    b_slab = np.zeros((NUM_LAYERS, LAST_OUT), np.float32)
    for l in range(NUM_LAYERS):
        b = np.asarray(params[l][1])
        b_slab[l, :b.shape[0]] = b
    return (jnp.asarray(w_slab).astype(jnp.bfloat16),
            jnp.asarray(w_last).astype(jnp.bfloat16),
            jnp.asarray(b_slab))


def build_pool_matrix():
    # AdaptiveAvgPool1d(3) over L=64 as a (64, 128) zero-padded averaging matrix.
    p = np.zeros((INPUT_RESOLUTION, PAD_W), np.float32)
    for j in range(POOL_OUT):
        s = (j * INPUT_RESOLUTION) // POOL_OUT
        e = -((-(j + 1) * INPUT_RESOLUTION) // POOL_OUT)   # ceil((j+1)*L / 3)
        p[s:e, j] = 1.0 / (e - s)
    return jnp.asarray(p)


def _round_up(a, b):
    return (a + b - 1) // b * b


# ---------------------------------------------------------------------------
# Wrapper
# ---------------------------------------------------------------------------
def convolutional_forward(x, packed, pool_mat, *, tm_max=256):
    N, C, L = x.shape
    assert L == INPUT_RESOLUTION
    w_slab, w_last, b_slab = packed

    rows = N * C
    # Row tile: 256 keeps the working set far under v7x's 32 MiB scoped VMEM
    # (input 64 KiB + outputs ~640 KiB double-buffered + ~0.5 MiB weights).
    tm = tm_max if rows >= tm_max else _round_up(rows, 8)
    rows_p = _round_up(rows, tm)

    x2 = x.reshape(rows, L)
    if rows_p != rows:
        x2 = jnp.pad(x2, ((0, rows_p - rows), (0, 0)))

    decoded_p, pooled_p = pl.pallas_call(
        fused_kernel,
        out_shape=(jax.ShapeDtypeStruct((rows_p, LAST_OUT), jnp.float32),
                   jax.ShapeDtypeStruct((rows_p, PAD_W), jnp.float32)),
        grid_spec=pltpu.PrefetchScalarGridSpec(
            num_scalar_prefetch=0,
            grid=(rows_p // tm,),
            in_specs=[
                pl.BlockSpec((tm, L), lambda i: (i, 0)),                     # x tile
                pl.BlockSpec((NUM_INNER, PAD_W, PAD_W), lambda i: (0, 0, 0)),  # packed inner weights
                pl.BlockSpec((PAD_W, LAST_OUT), lambda i: (0, 0)),           # last weight
                pl.BlockSpec((NUM_LAYERS, LAST_OUT), lambda i: (0, 0)),      # packed biases
                pl.BlockSpec((L, PAD_W), lambda i: (0, 0)),                  # pooling matrix
            ],
            out_specs=[
                pl.BlockSpec((tm, LAST_OUT), lambda i: (i, 0)),              # decoded
                pl.BlockSpec((tm, PAD_W), lambda i: (i, 0)),                 # pooled (padded)
            ],
        ),
        compiler_params=pltpu.CompilerParams(
            dimension_semantics=("parallel",)),
    )(x2, w_slab, w_last, b_slab, pool_mat)

    pooled = pooled_p[:rows, :POOL_OUT].reshape(N, C * POOL_OUT)
    decoded = decoded_p[:rows]
    # Module forward returns (pooled_flat, x); decoded is the (discarded-by-
    # PyTorch) autoencoder output, exposed only for verification.
    return (pooled, x), decoded


# ---------------------------------------------------------------------------
# Pure-JAX reference for verification (same bf16-dot / f32-accumulate recipe).
# ---------------------------------------------------------------------------
def reference_forward(x, params):
    N, C, L = x.shape
    h = x.reshape(N * C, L)
    for i, (w, b) in enumerate(params):
        h = jnp.dot(h.astype(jnp.bfloat16), w.astype(jnp.bfloat16),
                    preferred_element_type=jnp.float32) + b[None, :]
        if ACTS[i] == "relu":
            h = jnp.maximum(h, 0.0)
        elif ACTS[i] == "sigmoid":
            h = jax.nn.sigmoid(h)
    decoded = h
    outs = []
    for j in range(POOL_OUT):
        s = (j * L) // POOL_OUT
        e = -((-(j + 1) * L) // POOL_OUT)
        outs.append(jnp.mean(x[:, :, s:e], axis=-1, keepdims=True))
    pooled = jnp.concatenate(outs, axis=-1).reshape(N, C * POOL_OUT)
    return (pooled, x), decoded


if __name__ == "__main__":
    key = jax.random.PRNGKey(0)
    key, kx = jax.random.split(key)
    N, C = 2, 4
    x = jax.random.normal(kx, (N, C, INPUT_RESOLUTION), dtype=jnp.float32)
    params = init_params(key)
    packed = pack_params(params)
    pool_mat = build_pool_matrix()

    (pooled, x_p), decoded = convolutional_forward(x, packed, pool_mat)
    jax.block_until_ready((pooled, x_p, decoded))

    (ref_pooled, ref_xp), ref_decoded = reference_forward(x, params)

    assert pooled.shape == (N, C * POOL_OUT)
    assert x_p.shape == x.shape
    assert jnp.allclose(pooled, ref_pooled, rtol=1e-4, atol=1e-4)
    assert jnp.allclose(x_p, ref_xp)
    assert jnp.allclose(decoded, ref_decoded, rtol=2e-2, atol=2e-2)

    print("KERNEL_OK")
</pallas_src>

<mosaic_0001>
module attributes {stable_mosaic.version = 11 : i64} {
  func.func @fused_kernel(%arg0: i32, %arg1: memref<8x64xf32, #tpu.memory_space<vmem>>, %arg2: memref<10x128x128xbf16, #tpu.memory_space<vmem>>, %arg3: memref<128x512xbf16, #tpu.memory_space<vmem>>, %arg4: memref<11x512xf32, #tpu.memory_space<vmem>>, %arg5: memref<64x128xf32, #tpu.memory_space<vmem>>, %arg6: memref<8x512xf32, #tpu.memory_space<vmem>>, %arg7: memref<8x128xf32, #tpu.memory_space<vmem>>) attributes {dimension_semantics = [#tpu.dimension_semantics<parallel>], iteration_bounds = array<i64: 1>, scalar_prefetch = 0 : i64, scratch_operands = 0 : i64, tpu.core_type = #tpu.core_type<tc>, window_params = [{transform_indices = @transform_0, window_bounds = array<i64: 8, 64>}, {pipeline_mode = #tpu.pipeline_mode<synchronous>, transform_indices = @transform_1, window_bounds = array<i64: 10, 128, 128>}, {pipeline_mode = #tpu.pipeline_mode<synchronous>, transform_indices = @transform_2, window_bounds = array<i64: 128, 512>}, {pipeline_mode = #tpu.pipeline_mode<synchronous>, transform_indices = @transform_3, window_bounds = array<i64: 11, 512>}, {pipeline_mode = #tpu.pipeline_mode<synchronous>, transform_indices = @transform_4, window_bounds = array<i64: 64, 128>}, {transform_indices = @transform_5, window_bounds = array<i64: 8, 512>}, {transform_indices = @transform_6, window_bounds = array<i64: 8, 128>}]} {
    %c0 = arith.constant 0 : index
    %c0_0 = arith.constant 0 : index
    %0 = vector.load %arg1[%c0, %c0_0] : memref<8x64xf32, #tpu.memory_space<vmem>>, vector<8x64xf32>
    %c0_1 = arith.constant 0 : index
    %c0_2 = arith.constant 0 : index
    %1 = vector.load %arg5[%c0_1, %c0_2] : memref<64x128xf32, #tpu.memory_space<vmem>>, vector<64x128xf32>
    %cst = arith.constant dense<0.000000e+00> : vector<8x128xf32>
    %2 = tpu.matmul %0, %1, %cst {dimension_numbers = #tpu.dot_dimension_numbers<[1], [0], [0], [1], [0, 0, 1, 1], [], []>} : vector<8x64xf32>, vector<64x128xf32>, vector<8x128xf32> -> vector<8x128xf32>
    %c0_3 = arith.constant 0 : index
    %c0_4 = arith.constant 0 : index
    %3 = vector.load %arg7[%c0_3, %c0_4] : memref<8x128xf32, #tpu.memory_space<vmem>>, vector<8x128xf32>
    tpu.vector_store %arg7[%c0_3, %c0_4], %2 {strides = array<i32>} : memref<8x128xf32, #tpu.memory_space<vmem>>, vector<8x128xf32>,
    %c0_5 = arith.constant 0 : index
    %c0_6 = arith.constant 0 : index
    %4 = vector.load %arg4[%c0_5, %c0_6] : memref<11x512xf32, #tpu.memory_space<vmem>>, vector<11x512xf32>
    %c0_7 = arith.constant 0 : index
    %c0_8 = arith.constant 0 : index
    %c0_9 = arith.constant 0 : index
    %5 = vector.load %arg2[%c0_7, %c0_8, %c0_9] : memref<10x128x128xbf16, #tpu.memory_space<vmem>>, vector<1x128x128xbf16>
    %6 = vector.shape_cast %5 : vector<1x128x128xbf16> to vector<128x128xbf16>
    %7 = arith.truncf %0 : vector<8x64xf32> to vector<8x64xbf16>
    %8 = vector.extract_strided_slice %6 {offsets = [0, 0], sizes = [64, 128], strides = [1, 1]} : vector<128x128xbf16> to vector<64x128xbf16>
    %cst_10 = arith.constant dense<0.000000e+00> : vector<8x128xf32>
    %9 = tpu.matmul %7, %8, %cst_10 {dimension_numbers = #tpu.dot_dimension_numbers<[1], [0], [0], [1], [0, 0, 1, 1], [], []>} : vector<8x64xbf16>, vector<64x128xbf16>, vector<8x128xf32> -> vector<8x128xf32>
    %10 = vector.extract_strided_slice %4 {offsets = [0, 0], sizes = [1, 128], strides = [1, 1]} : vector<11x512xf32> to vector<1x128xf32>
    %11 = vector.broadcast %10 : vector<1x128xf32> to vector<8x128xf32>
    %12 = arith.addf %9, %11 : vector<8x128xf32>
    %cst_11 = arith.constant 0.000000e+00 : f32
    %13 = vector.broadcast %cst_11 : f32 to vector<8x128xf32>
    %14 = arith.maximumf %12, %13 : vector<8x128xf32>
    %15 = arith.truncf %14 : vector<8x128xf32> to vector<8x128xbf16>
    %c1 = arith.constant 1 : index
    %c0_12 = arith.constant 0 : index
    %c0_13 = arith.constant 0 : index
    %16 = vector.load %arg2[%c1, %c0_12, %c0_13] : memref<10x128x128xbf16, #tpu.memory_space<vmem>>, vector<1x128x128xbf16>
    %17 = vector.shape_cast %16 : vector<1x128x128xbf16> to vector<128x128xbf16>
    %cst_14 = arith.constant dense<0.000000e+00> : vector<8x128xf32>
    %18 = tpu.matmul %15, %17, %cst_14 {dimension_numbers = #tpu.dot_dimension_numbers<[1], [0], [0], [1], [0, 0, 1, 1], [], []>} : vector<8x128xbf16>, vector<128x128xbf16>, vector<8x128xf32> -> vector<8x128xf32>
    %19 = vector.extract_strided_slice %4 {offsets = [1, 0], sizes = [1, 128], strides = [1, 1]} : vector<11x512xf32> to vector<1x128xf32>
    %20 = vector.broadcast %19 : vector<1x128xf32> to vector<8x128xf32>
    %21 = arith.addf %18, %20 : vector<8x128xf32>
    %cst_15 = arith.constant 0.000000e+00 : f32
    %22 = vector.broadcast %cst_15 : f32 to vector<8x128xf32>
    %23 = arith.maximumf %21, %22 : vector<8x128xf32>
    %24 = arith.truncf %23 : vector<8x128xf32> to vector<8x128xbf16>
    %c2 = arith.constant 2 : index
    %c0_16 = arith.constant 0 : index
    %c0_17 = arith.constant 0 : index
    %25 = vector.load %arg2[%c2, %c0_16, %c0_17] : memref<10x128x128xbf16, #tpu.memory_space<vmem>>, vector<1x128x128xbf16>
    %26 = vector.shape_cast %25 : vector<1x128x128xbf16> to vector<128x128xbf16>
    %cst_18 = arith.constant dense<0.000000e+00> : vector<8x128xf32>
    %27 = tpu.matmul %24, %26, %cst_18 {dimension_numbers = #tpu.dot_dimension_numbers<[1], [0], [0], [1], [0, 0, 1, 1], [], []>} : vector<8x128xbf16>, vector<128x128xbf16>, vector<8x128xf32> -> vector<8x128xf32>
    %28 = vector.extract_strided_slice %4 {offsets = [2, 0], sizes = [1, 128], strides = [1, 1]} : vector<11x512xf32> to vector<1x128xf32>
    %29 = vector.broadcast %28 : vector<1x128xf32> to vector<8x128xf32>
    %30 = arith.addf %27, %29 : vector<8x128xf32>
    %cst_19 = arith.constant 0.000000e+00 : f32
    %31 = vector.broadcast %cst_19 : f32 to vector<8x128xf32>
    %32 = arith.maximumf %30, %31 : vector<8x128xf32>
    %33 = arith.truncf %32 : vector<8x128xf32> to vector<8x128xbf16>
    %c3 = arith.constant 3 : index
    %c0_20 = arith.constant 0 : index
    %c0_21 = arith.constant 0 : index
    %34 = vector.load %arg2[%c3, %c0_20, %c0_21] : memref<10x128x128xbf16, #tpu.memory_space<vmem>>, vector<1x128x128xbf16>
    %35 = vector.shape_cast %34 : vector<1x128x128xbf16> to vector<128x128xbf16>
    %cst_22 = arith.constant dense<0.000000e+00> : vector<8x128xf32>
    %36 = tpu.matmul %33, %35, %cst_22 {dimension_numbers = #tpu.dot_dimension_numbers<[1], [0], [0], [1], [0, 0, 1, 1], [], []>} : vector<8x128xbf16>, vector<128x128xbf16>, vector<8x128xf32> -> vector<8x128xf32>
    %37 = vector.extract_strided_slice %4 {offsets = [3, 0], sizes = [1, 128], strides = [1, 1]} : vector<11x512xf32> to vector<1x128xf32>
    %38 = vector.broadcast %37 : vector<1x128xf32> to vector<8x128xf32>
    %39 = arith.addf %36, %38 : vector<8x128xf32>
    %cst_23 = arith.constant 0.000000e+00 : f32
    %40 = vector.broadcast %cst_23 : f32 to vector<8x128xf32>
    %41 = arith.maximumf %39, %40 : vector<8x128xf32>
    %42 = arith.truncf %41 : vector<8x128xf32> to vector<8x128xbf16>
    %c4 = arith.constant 4 : index
    %c0_24 = arith.constant 0 : index
    %c0_25 = arith.constant 0 : index
    %43 = vector.load %arg2[%c4, %c0_24, %c0_25] : memref<10x128x128xbf16, #tpu.memory_space<vmem>>, vector<1x128x128xbf16>
    %44 = vector.shape_cast %43 : vector<1x128x128xbf16> to vector<128x128xbf16>
    %cst_26 = arith.constant dense<0.000000e+00> : vector<8x128xf32>
    %45 = tpu.matmul %42, %44, %cst_26 {dimension_numbers = #tpu.dot_dimension_numbers<[1], [0], [0], [1], [0, 0, 1, 1], [], []>} : vector<8x128xbf16>, vector<128x128xbf16>, vector<8x128xf32> -> vector<8x128xf32>
    %46 = vector.extract_strided_slice %4 {offsets = [4, 0], sizes = [1, 128], strides = [1, 1]} : vector<11x512xf32> to vector<1x128xf32>
    %47 = vector.broadcast %46 : vector<1x128xf32> to vector<8x128xf32>
    %48 = arith.addf %45, %47 : vector<8x128xf32>
    %49 = arith.truncf %48 : vector<8x128xf32> to vector<8x128xbf16>
    %c5 = arith.constant 5 : index
    %c0_27 = arith.constant 0 : index
    %c0_28 = arith.constant 0 : index
    %50 = vector.load %arg2[%c5, %c0_27, %c0_28] : memref<10x128x128xbf16, #tpu.memory_space<vmem>>, vector<1x128x128xbf16>
    %51 = vector.shape_cast %50 : vector<1x128x128xbf16> to vector<128x128xbf16>
    %cst_29 = arith.constant dense<0.000000e+00> : vector<8x128xf32>
    %52 = tpu.matmul %49, %51, %cst_29 {dimension_numbers = #tpu.dot_dimension_numbers<[1], [0], [0], [1], [0, 0, 1, 1], [], []>} : vector<8x128xbf16>, vector<128x128xbf16>, vector<8x128xf32> -> vector<8x128xf32>
    %53 = vector.extract_strided_slice %4 {offsets = [5, 0], sizes = [1, 128], strides = [1, 1]} : vector<11x512xf32> to vector<1x128xf32>
    %54 = vector.broadcast %53 : vector<1x128xf32> to vector<8x128xf32>
    %55 = arith.addf %52, %54 : vector<8x128xf32>
    %cst_30 = arith.constant 0.000000e+00 : f32
    %56 = vector.broadcast %cst_30 : f32 to vector<8x128xf32>
    %57 = arith.maximumf %55, %56 : vector<8x128xf32>
    %58 = arith.truncf %57 : vector<8x128xf32> to vector<8x128xbf16>
    %c6 = arith.constant 6 : index
    %c0_31 = arith.constant 0 : index
    %c0_32 = arith.constant 0 : index
    %59 = vector.load %arg2[%c6, %c0_31, %c0_32] : memref<10x128x128xbf16, #tpu.memory_space<vmem>>, vector<1x128x128xbf16>
    %60 = vector.shape_cast %59 : vector<1x128x128xbf16> to vector<128x128xbf16>
    %cst_33 = arith.constant dense<0.000000e+00> : vector<8x128xf32>
    %61 = tpu.matmul %58, %60, %cst_33 {dimension_numbers = #tpu.dot_dimension_numbers<[1], [0], [0], [1], [0, 0, 1, 1], [], []>} : vector<8x128xbf16>, vector<128x128xbf16>, vector<8x128xf32> -> vector<8x128xf32>
    %62 = vector.extract_strided_slice %4 {offsets = [6, 0], sizes = [1, 128], strides = [1, 1]} : vector<11x512xf32> to vector<1x128xf32>
    %63 = vector.broadcast %62 : vector<1x128xf32> to vector<8x128xf32>
    %64 = arith.addf %61, %63 : vector<8x128xf32>
    %cst_34 = arith.constant 0.000000e+00 : f32
    %65 = vector.broadcast %cst_34 : f32 to vector<8x128xf32>
    %66 = arith.maximumf %64, %65 : vector<8x128xf32>
    %67 = arith.truncf %66 : vector<8x128xf32> to vector<8x128xbf16>
    %c7 = arith.constant 7 : index
    %c0_35 = arith.constant 0 : index
    %c0_36 = arith.constant 0 : index
    %68 = vector.load %arg2[%c7, %c0_35, %c0_36] : memref<10x128x128xbf16, #tpu.memory_space<vmem>>, vector<1x128x128xbf16>
    %69 = vector.shape_cast %68 : vector<1x128x128xbf16> to vector<128x128xbf16>
    %cst_37 = arith.constant dense<0.000000e+00> : vector<8x128xf32>
    %70 = tpu.matmul %67, %69, %cst_37 {dimension_numbers = #tpu.dot_dimension_numbers<[1], [0], [0], [1], [0, 0, 1, 1], [], []>} : vector<8x128xbf16>, vector<128x128xbf16>, vector<8x128xf32> -> vector<8x128xf32>
    %71 = vector.extract_strided_slice %4 {offsets = [7, 0], sizes = [1, 128], strides = [1, 1]} : vector<11x512xf32> to vector<1x128xf32>
    %72 = vector.broadcast %71 : vector<1x128xf32> to vector<8x128xf32>
    %73 = arith.addf %70, %72 : vector<8x128xf32>
    %cst_38 = arith.constant 0.000000e+00 : f32
    %74 = vector.broadcast %cst_38 : f32 to vector<8x128xf32>
    %75 = arith.maximumf %73, %74 : vector<8x128xf32>
    %76 = arith.truncf %75 : vector<8x128xf32> to vector<8x128xbf16>
    %c8 = arith.constant 8 : index
    %c0_39 = arith.constant 0 : index
    %c0_40 = arith.constant 0 : index
    %77 = vector.load %arg2[%c8, %c0_39, %c0_40] : memref<10x128x128xbf16, #tpu.memory_space<vmem>>, vector<1x128x128xbf16>
    %78 = vector.shape_cast %77 : vector<1x128x128xbf16> to vector<128x128xbf16>
    %cst_41 = arith.constant dense<0.000000e+00> : vector<8x128xf32>
    %79 = tpu.matmul %76, %78, %cst_41 {dimension_numbers = #tpu.dot_dimension_numbers<[1], [0], [0], [1], [0, 0, 1, 1], [], []>} : vector<8x128xbf16>, vector<128x128xbf16>, vector<8x128xf32> -> vector<8x128xf32>
    %80 = vector.extract_strided_slice %4 {offsets = [8, 0], sizes = [1, 128], strides = [1, 1]} : vector<11x512xf32> to vector<1x128xf32>
    %81 = vector.broadcast %80 : vector<1x128xf32> to vector<8x128xf32>
    %82 = arith.addf %79, %81 : vector<8x128xf32>
    %cst_42 = arith.constant 0.000000e+00 : f32
    %83 = vector.broadcast %cst_42 : f32 to vector<8x128xf32>
    %84 = arith.maximumf %82, %83 : vector<8x128xf32>
    %85 = arith.truncf %84 : vector<8x128xf32> to vector<8x128xbf16>
    %c9 = arith.constant 9 : index
    %c0_43 = arith.constant 0 : index
    %c0_44 = arith.constant 0 : index
    %86 = vector.load %arg2[%c9, %c0_43, %c0_44] : memref<10x128x128xbf16, #tpu.memory_space<vmem>>, vector<1x128x128xbf16>
    %87 = vector.shape_cast %86 : vector<1x128x128xbf16> to vector<128x128xbf16>
    %cst_45 = arith.constant dense<0.000000e+00> : vector<8x128xf32>
    %88 = tpu.matmul %85, %87, %cst_45 {dimension_numbers = #tpu.dot_dimension_numbers<[1], [0], [0], [1], [0, 0, 1, 1], [], []>} : vector<8x128xbf16>, vector<128x128xbf16>, vector<8x128xf32> -> vector<8x128xf32>
    %89 = vector.extract_strided_slice %4 {offsets = [9, 0], sizes = [1, 128], strides = [1, 1]} : vector<11x512xf32> to vector<1x128xf32>
    %90 = vector.broadcast %89 : vector<1x128xf32> to vector<8x128xf32>
    %91 = arith.addf %88, %90 : vector<8x128xf32>
    %cst_46 = arith.constant 0.000000e+00 : f32
    %92 = vector.broadcast %cst_46 : f32 to vector<8x128xf32>
    %93 = arith.maximumf %91, %92 : vector<8x128xf32>
    %94 = arith.truncf %93 : vector<8x128xf32> to vector<8x128xbf16>
    %c0_47 = arith.constant 0 : index
    %c0_48 = arith.constant 0 : index
    %95 = vector.load %arg3[%c0_47, %c0_48] : memref<128x512xbf16, #tpu.memory_space<vmem>>, vector<128x512xbf16>
    %cst_49 = arith.constant dense<0.000000e+00> : vector<8x512xf32>
    %96 = tpu.matmul %94, %95, %cst_49 {dimension_numbers = #tpu.dot_dimension_numbers<[1], [0], [0], [1], [0, 0, 1, 1], [], []>} : vector<8x128xbf16>, vector<128x512xbf16>, vector<8x512xf32> -> vector<8x512xf32>
    %97 = vector.extract_strided_slice %4 {offsets = [10, 0], sizes = [1, 512], strides = [1, 1]} : vector<11x512xf32> to vector<1x512xf32>
    %98 = vector.broadcast %97 : vector<1x512xf32> to vector<8x512xf32>
    %99 = arith.addf %96, %98 : vector<8x512xf32>
    %100 = arith.negf %99 : vector<8x512xf32>
    %101 = math.exp %100 : vector<8x512xf32>
    %cst_50 = arith.constant 1.000000e+00 : f32
    %102 = vector.broadcast %cst_50 : f32 to vector<8x512xf32>
    %103 = arith.addf %102, %101 : vector<8x512xf32>
    %104 = arith.divf %102, %103 : vector<8x512xf32>
    %c0_51 = arith.constant 0 : index
    %c0_52 = arith.constant 0 : index
    %105 = vector.load %arg6[%c0_51, %c0_52] : memref<8x512xf32, #tpu.memory_space<vmem>>, vector<8x512xf32>
    tpu.vector_store %arg6[%c0_51, %c0_52], %104 {strides = array<i32>} : memref<8x512xf32, #tpu.memory_space<vmem>>, vector<8x512xf32>,
    return
  }
  func.func @transform_0(%arg0: i32) -> (i32, i32) {
    %c0_i32 = arith.constant 0 : i32
    %c0_i32_0 = arith.constant 0 : i32
    return %arg0, %c0_i32 : i32, i32
  }
  func.func @transform_1(%arg0: i32) -> (i32, i32, i32) {
    %c0_i32 = arith.constant 0 : i32
    %c0_i32_0 = arith.constant 0 : i32
    %c0_i32_1 = arith.constant 0 : i32
    %c0_i32_2 = arith.constant 0 : i32
    return %c0_i32, %c0_i32_0, %c0_i32_1 : i32, i32, i32
  }
  func.func @transform_2(%arg0: i32) -> (i32, i32) {
    %c0_i32 = arith.constant 0 : i32
    %c0_i32_0 = arith.constant 0 : i32
    %c0_i32_1 = arith.constant 0 : i32
    return %c0_i32, %c0_i32_0 : i32, i32
  }
  func.func @transform_3(%arg0: i32) -> (i32, i32) {
    %c0_i32 = arith.constant 0 : i32
    %c0_i32_0 = arith.constant 0 : i32
    %c0_i32_1 = arith.constant 0 : i32
    return %c0_i32, %c0_i32_0 : i32, i32
  }
  func.func @transform_4(%arg0: i32) -> (i32, i32) {
    %c0_i32 = arith.constant 0 : i32
    %c0_i32_0 = arith.constant 0 : i32
    %c0_i32_1 = arith.constant 0 : i32
    return %c0_i32, %c0_i32_0 : i32, i32
  }
  func.func @transform_5(%arg0: i32) -> (i32, i32) {
    %c0_i32 = arith.constant 0 : i32
    %c0_i32_0 = arith.constant 0 : i32
    return %arg0, %c0_i32 : i32, i32
  }
  func.func @transform_6(%arg0: i32) -> (i32, i32) {
    %c0_i32 = arith.constant 0 : i32
    %c0_i32_0 = arith.constant 0 : i32
    return %arg0, %c0_i32 : i32, i32
  }
}

</mosaic_0001>

<bundles_post_ra>
// kernel: tpu_custom_call.1
= control target key start
LH: loop header
LB: loop body
LE: loop exit
PB: predicated region body
PF: predicated region fallthrough
CT: control target
= control target key end

     0   :  { %12 = vsyncpa [#allocation3], 0  ;;  %s2649_s0 = inlined_call_operand.hbm [shape: f32[8,64], index: 0, kind: input, shape index: {}]   ;;  %s2650_s1 = inlined_call_operand.hbm [shape: bf16[10,128,128], index: 1, kind: input, shape index: {}]   ;;  %s2651_s2 = inlined_call_operand.hbm [shape: bf16[128,512], index: 2, kind: input, shape index: {}]   ;;  %s2652_s3 = inlined_call_operand.hbm [shape: f32[11,512], index: 3, kind: input, shape index: {}]   ;;  %s2653_s4 = inlined_call_operand.hbm [shape: f32[64,128], index: 4, kind: input, shape index: {}]   ;;  %s2654_s5 = inlined_call_operand.hbm [shape: f32[8,512], index: 5, kind: output, shape index: {0}]   ;;  %s2655_s6 = inlined_call_operand.hbm [shape: f32[8,128], index: 6, kind: output, shape index: {1}]  }
   0x1   :  { %13 = vsyncpa [#allocation6], 0 }
   0x2   :  { %14 = vsyncpa [#allocation9], 0 }
   0x3   :  { %15 = vsyncpa [#allocation4], 0 }
   0x4   :  { %16 = vsyncpa [#allocation13], 0  ;;  %s2364_s21 = smov [#allocation5]   ;;  %s2200_s25 = scalar_lea.hbm %s2650_s1, 10240 }
   0x5   :  { %s32_s22 = sshll.u32 %s2364_s21, 4  ;;  %p2201_p0 = scmp.ne.s32.totalorder %s2650_s1, %s2200_s25  ;;  %s33_s22 = int_to_ptr.vmem [resolvable:$true] %s32_s22 }
   0x6   :  { %p2204_p1 = scmp.lt.u32.totalorder %s2200_s25, %s2650_s1 }
   0x8   :  { %p2206_p2 = pnand %p2204_p1, %p2201_p0 }
   0xa   :  { %2209 = shalt.err (!%p2206_p2)
}
   0xb   :  { %s2210_s30 = scalar_lea.vmem %s33_s22, 10240  ;;  %p2215_p4 = scmp.lt.s32.totalorder %s33_s22, %s33_s22 }
   0xc   :  { %p2211_p3 = scmp.ne.s32.totalorder %s33_s22, %s2210_s30  ;;  %p2216_p5 = scmp.lt.s32.totalorder %s2210_s30, %s2210_s30 }
   0xe   :  { %p2217_p6 = por %p2216_p5, %p2215_p4 }
  0x10   :  { %p2218_p7 = pnand %p2217_p6, %p2211_p3 }
  0x12   :  { %2221 = shalt.err (!%p2218_p7)
}
  0x13   :  { %s2365_s7 = smov 64   ;;  %s2366_s8 = smov 4  }
  0x14   :  { %38 = dma.hbm_to_vmem [thread:$0]  %s2650_s1, 10240, %s33_s22, [#allocation6], %s2365_s7, %s2365_s7, %s2366_s8  }
  0x15   :  { %s2367_s11 = smov [#allocation8]   ;;  %s2222_s15 = scalar_lea.hbm %s2652_s3, 1024 }
  0x16   :  { %s56_s12 = sshll.u32 %s2367_s11, 4  ;;  %p2223_p8 = scmp.ne.s32.totalorder %s2652_s3, %s2222_s15  ;;  %s57_s12 = int_to_ptr.vmem [resolvable:$true] %s56_s12 }
  0x17   :  { %p2226_p9 = scmp.lt.u32.totalorder %s2222_s15, %s2652_s3 }
  0x19   :  { %p2228_p10 = pnand %p2226_p9, %p2223_p8 }
  0x1b   :  { %2231 = shalt.err (!%p2228_p10)
}
  0x1c   :  { %s2232_s20 = scalar_lea.vmem %s57_s12, 1024  ;;  %p2237_p12 = scmp.lt.s32.totalorder %s57_s12, %s57_s12 }
  0x1d   :  { %p2233_p11 = scmp.ne.s32.totalorder %s57_s12, %s2232_s20  ;;  %p2238_p13 = scmp.lt.s32.totalorder %s2232_s20, %s2232_s20 }
  0x1f   :  { %p2239_p0 = por %p2238_p13, %p2237_p12 }
  0x21   :  { %p2240_p1 = pnand %p2239_p0, %p2233_p11 }
  0x23   :  { %2243 = shalt.err (!%p2240_p1)
}
  0x24   :  { %s2368_s1 = smov 512   ;;  %s2369_s21 = smov 32  }
  0x25   :  { %62 = dma.hbm_to_vmem [thread:$0]  %s2652_s3, 1024, %s57_s12, [#allocation9], %s2368_s1, %s2368_s1, %s2369_s21  }
  0x26   :  { %s2370_s24 = smov [#allocation2]   ;;  %s2371_s26 = smov [#allocation7]  }
  0x27   :  { %s23_s25 = sshll.u32 %s2370_s24, 4  ;;  %s44_s27 = sshll.u32 %s2371_s26, 4  ;;  %s24_s25 = int_to_ptr.vmem [resolvable:$true] %s23_s25  ;;  %s2442_s27 = int_to_ptr.vmem [resolvable:$true] %s44_s27 }
  0x28   :  { %s2244_s30 = scalar_lea.hbm %s2649_s0, 128 }
  0x29   :  { %p2245_p2 = scmp.ne.s32.totalorder %s2649_s0, %s2244_s30  ;;  %p2248_p3 = scmp.lt.u32.totalorder %s2244_s30, %s2649_s0 }
  0x2b   :  { %p2250_p4 = pnand %p2248_p3, %p2245_p2 }
  0x2d   :  { %2253 = shalt.err (!%p2250_p4)
}
  0x2e   :  { %s2254_s3 = scalar_lea.vmem %s24_s25, 128  ;;  %p2259_p6 = scmp.lt.s32.totalorder %s24_s25, %s24_s25 }
  0x2f   :  { %p2255_p5 = scmp.ne.s32.totalorder %s24_s25, %s2254_s3  ;;  %p2260_p7 = scmp.lt.s32.totalorder %s2254_s3, %s2254_s3 }
  0x31   :  { %p2261_p8 = por %p2260_p7, %p2259_p6 }
  0x33   :  { %p2262_p9 = pnand %p2261_p8, %p2255_p5 }
  0x35   :  { %2265 = shalt.err (!%p2262_p9)
}
  0x36   :  { %26 = dma.hbm_to_vmem [thread:$0]  %s2649_s0, 128, %s24_s25, [#allocation3]  }
  0x37   :  { %s2266_s15 = scalar_lea.hbm %s2651_s2, 4096 }
  0x38   :  { %p2267_p10 = scmp.ne.s32.totalorder %s2651_s2, %s2266_s15  ;;  %p2270_p11 = scmp.lt.u32.totalorder %s2266_s15, %s2651_s2 }
  0x3a   :  { %p2272_p12 = pnand %p2270_p11, %p2267_p10 }
  0x3c   :  { %2275 = shalt.err (!%p2272_p12)
}
  0x3d   :  { %s2276_s20 = scalar_lea.vmem %s2442_s27, 4096  ;;  %p2281_p0 = scmp.lt.s32.totalorder %s2442_s27, %s2442_s27 }
  0x3e   :  { %p2277_p13 = scmp.ne.s32.totalorder %s2442_s27, %s2276_s20  ;;  %p2282_p1 = scmp.lt.s32.totalorder %s2276_s20, %s2276_s20 }
  0x40   :  { %p2283_p2 = por %p2282_p1, %p2281_p0 }
  0x42   :  { %p2284_p3 = pnand %p2283_p2, %p2277_p13 }
  0x44   :  { %2287 = shalt.err (!%p2284_p3)
}
  0x45   :  { %s2372_s0 = smov 256   ;;  %s2373_s1 = smov 16  }
  0x46   :  { %50 = dma.hbm_to_vmem [thread:$0]  %s2651_s2, 4096, %s2442_s27, [#allocation6], %s2372_s0, %s2372_s0, %s2373_s1  }
  0x47   :  { %s2374_s23 = smov [#allocation10]   ;;  %s2288_s28 = scalar_lea.hbm %s2653_s4, 1024 }
  0x48   :  { %s68_s24 = sshll.u32 %s2374_s23, 4  ;;  %p2289_p4 = scmp.ne.s32.totalorder %s2653_s4, %s2288_s28  ;;  %s69_s24 = int_to_ptr.vmem [resolvable:$true] %s68_s24 }
  0x49   :  { %p2292_p5 = scmp.lt.u32.totalorder %s2288_s28, %s2653_s4 }
  0x4b   :  { %p2294_p6 = pnand %p2292_p5, %p2289_p4 }
  0x4d   :  { %2297 = shalt.err (!%p2294_p6)
}
  0x4e   :  { %s2298_s9 = scalar_lea.vmem %s69_s24, 1024  ;;  %p2303_p8 = scmp.lt.s32.totalorder %s69_s24, %s69_s24 }
  0x4f   :  { %p2299_p7 = scmp.ne.s32.totalorder %s69_s24, %s2298_s9  ;;  %p2304_p9 = scmp.lt.s32.totalorder %s2298_s9, %s2298_s9 }
  0x51   :  { %p2305_p10 = por %p2304_p9, %p2303_p8 }
  0x53   :  { %p2306_p11 = pnand %p2305_p10, %p2299_p7 }
  0x55   :  { %2309 = shalt.err (!%p2306_p11)
}
  0x56   :  { %s2375_s2 = smov 128   ;;  %s2376_s27 = smov 8  }
  0x57   :  { %74 = dma.hbm_to_vmem [thread:$0]  %s2653_s4, 1024, %s69_s24, [#allocation9], %s2375_s2, %s2375_s2, %s2376_s27  }
  0x58   :  { %2354 = dma.done.wait [#allocation3], 128  }
  0x59   :  { %2355 = vsyncadd [#allocation3], 4294967168 }
  0x5a   :  { %2356 = dma.done.wait [#allocation6], 14336  }
  0x5b   :  { %2357 = vsyncadd [#allocation6], 4294952960 }
  0x5c   :  { %2358 = dma.done.wait [#allocation9], 2048  }
  0x5d   :  { %2359 = vsyncadd [#allocation9], 4294965248  ;;  %v2377_v0 = vmov 0.0|0.0   ;;  %vm2378_vm0 = vmmov 0   ;;  %v2379_v1 = vmov 0.0   ;;  %v92_v2 = vld [vmem:[#allocation10] sm:$0xff]  ;;  %v189_v36 = vlaneseq }
  0x5e   :  { %2029 = vmatprep.subr.bf16.mxu1 %v2377_v0  ;;  %1834 = vmatprep.mubr.msk.f32.mxu1 %vm2378_vm0, %v2379_v1  ;;  %v93_v3 = vld [vmem:[#allocation10 + $0x8] sm:$0xff]  ;;  %v94_v4 = vld [vmem:[#allocation10 + $0x10] sm:$0xff]  ;;  %v95_v6 = vld [vmem:[#allocation10 + $0x18] sm:$0xff]  ;;  %vm100_vm1 = vcmask 523264   ;;  %s2381_s4 = smov [#allocation12]  }
  0x5f   :  { %1849 = vmatprep.subr.bf16.mxu0 %v2379_v1  ;;  %1865 = vmatprep.mubr.msk.bf16.mxu0 %vm2378_vm0, %v2379_v1  ;;  %v2030_v5 = vpack.c.bf16 %v93_v3, %v92_v2  ;;  %v2033_v7 = vpack.c.bf16 %v95_v6, %v94_v4  ;;  %v96_v8 = vld [vmem:[#allocation10 + $0x20] sm:$0xff]  ;;  %v97_v9 = vld [vmem:[#allocation10 + $0x28] sm:$0xff]  ;;  %v98_v10 = vld [vmem:[#allocation10 + $0x30] sm:$0xff]  ;;  %v2515_v37 = vshrl.u32 %v189_v36, 7  ;;  %s1594_s11 = sshll.u32 %s2381_s4, 4  ;;  %s1595_s11 = int_to_ptr.vmem [resolvable:$true] %s1594_s11 }
  0x60   :  { %v99_v11 = vld [vmem:[#allocation10 + $0x38] sm:$0xff]  ;;  %v2036_v12 = vpack.c.bf16 %v97_v9, %v96_v8  ;;  %v2064_v13 = vld [vmem:[#allocation5 + $0x40] sm:$0xff]   ;;  %v2065_v14 = vld [vmem:[#allocation5 + $0x48] sm:$0xff]   ;;  %s2310_s12 = scalar_lea.vmem %s1595_s11, 128  ;;  %p2315_p13 = scmp.lt.s32.totalorder %s1595_s11, %s1595_s11 }
  0x61   :  { %2031 = vmatpush3.bf16.msra.mxu1 %v2030_v5  ;;  %1850 = vmatpush3.bf16.msra.mxu0 %v2064_v13  ;;  %v2039_v15 = vpack.c.bf16 %v99_v11, %v98_v10  ;;  %v91_v16 = vld [vmem:[#allocation2] sm:$0xff]  ;;  %v2060_v17 = vld [vmem:[#allocation5] sm:$0xff]   ;;  %v2061_v18 = vld [vmem:[#allocation5 + $0x8] sm:$0xff]   ;;  %v191_v38 = vsub.s32 0, %v2515_v37  ;;  %v281_v56 = vsub.s32 1, %v2515_v37  ;;  %v2548_v10 = vsub.s32 2, %v2515_v37  ;;  %p2311_p12 = scmp.ne.s32.totalorder %s1595_s11, %s2310_s12  ;;  %p2316_p0 = scmp.lt.s32.totalorder %s2310_s12, %s2310_s12 }
  0x62   :  { %2032 = vmatprep.subr.bf16.mxu1 %v2377_v0  ;;  %1851 = vmatprep.subr.bf16.mxu0 %v2379_v1  ;;  %v2062_v19 = vld [vmem:[#allocation5 + $0x10] sm:$0xff]   ;;  %v2063_v20 = vld [vmem:[#allocation5 + $0x18] sm:$0xff]   ;;  %v188_v21 = vpack.c.bf16 %v91_v16, %v91_v16  ;;  %v2068_v24 = vld [vmem:[#allocation5 + $0x60] sm:$0xff]  }
  0x63   :  { %v2066_v22 = vld [vmem:[#allocation5 + $0x50] sm:$0xff]   ;;  %v2067_v23 = vld [vmem:[#allocation5 + $0x58] sm:$0xff]   ;;  %v2069_v25 = vld [vmem:[#allocation5 + $0x68] sm:$0xff]   ;;  %p2317_p1 = por %p2316_p0, %p2315_p13 }
  0x64   :  { %v2070_v26 = vld [vmem:[#allocation5 + $0x70] sm:$0xff]   ;;  %v2071_v27 = vld [vmem:[#allocation5 + $0x78] sm:$0xff]   ;;  %v2072_v28 = vld [vmem:[#allocation5 + $0x80] sm:$0xff]  }
  0x65   :  { %2034 = vmatpush3.bf16.msra.mxu1 %v2033_v7  ;;  %1852 = vmatpush3.bf16.msra.mxu0 %v2065_v14  ;;  %v2073_v29 = vld [vmem:[#allocation5 + $0x88] sm:$0xff]   ;;  %v2074_v30 = vld [vmem:[#allocation5 + $0x90] sm:$0xff]   ;;  %v2075_v31 = vld [vmem:[#allocation5 + $0x98] sm:$0xff]   ;;  %p2318_p2 = pnand %p2317_p1, %p2311_p12 }
  0x66   :  { %2035 = vmatprep.subr.bf16.mxu1 %v2377_v0  ;;  %1853 = vmatprep.subr.bf16.mxu0 %v2379_v1  ;;  %v2076_v32 = vld [vmem:[#allocation5 + $0xa0] sm:$0xff]   ;;  %v2077_v33 = vld [vmem:[#allocation5 + $0xa8] sm:$0xff]   ;;  %v2078_v48 = vld [vmem:[#allocation5 + $0xb0] sm:$0xff]  }
  0x67   :  { %v2518_v39 = vld [vmem:[#allocation8] sm:$0xff]  ;;  %v2079_v49 = vld [vmem:[#allocation5 + $0xb8] sm:$0xff]   ;;  %v2081_v51 = vld [vmem:[#allocation5 + $0xc8] sm:$0xff]  }
  0x68   :  { %v192_v40 = vrot.slane %v2518_v39, %v191_v38  ;;  %v2080_v50 = vld [vmem:[#allocation5 + $0xc0] sm:$0xff]   ;;  %v2082_v52 = vld [vmem:[#allocation5 + $0xd0] sm:$0xff]   ;;  %v2083_v53 = vld [vmem:[#allocation5 + $0xd8] sm:$0xff]   ;;  %v282_v57 = vrot.slane %v2518_v39, %v281_v56  ;;  %v393_v11 = vrot.slane %v2518_v39, %v2548_v10 }
  0x69   :  { %2037 = vmatpush3.bf16.msra.mxu1 %v2036_v12  ;;  %1854 = vmatpush3.bf16.msra.mxu0 %v2066_v22  ;;  %v2084_v54 = vld [vmem:[#allocation5 + $0xe0] sm:$0xff]   ;;  %v2085_v55 = vld [vmem:[#allocation5 + $0xe8] sm:$0xff]   ;;  %v2086_v2 = vld [vmem:[#allocation5 + $0xf0] sm:$0xff]  }
  0x6a   :  { %2038 = vmatprep.subr.bf16.mxu1 %v2377_v0  ;;  %1855 = vmatprep.subr.bf16.mxu0 %v2379_v1  ;;  %v2087_v3 = vld [vmem:[#allocation5 + $0xf8] sm:$0xff]   ;;  %v2088_v4 = vld [vmem:[#allocation5 + $0x100] sm:$0xff]   ;;  %v2089_v5 = vld [vmem:[#allocation5 + $0x108] sm:$0xff]  }
  0x6b   :  { %v2090_v6 = vld [vmem:[#allocation5 + $0x110] sm:$0xff]   ;;  %v2091_v7 = vld [vmem:[#allocation5 + $0x118] sm:$0xff]   ;;  %v2092_v8 = vld [vmem:[#allocation5 + $0x120] sm:$0xff]  }
  0x6c   :  { %v2093_v9 = vld [vmem:[#allocation5 + $0x128] sm:$0xff]  }
  0x6d   :  { %2040 = vmatpush3.bf16.msra.mxu1 %v2039_v15  ;;  %1856 = vmatpush3.bf16.msra.mxu0 %v2067_v23  ;;  %v2097_v22 = vld [vmem:[#allocation5 + $0x148] sm:$0xff]   ;;  %v2098_v23 = vld [vmem:[#allocation5 + $0x150] sm:$0xff]  }
  0x6e   :  { %1837 = vmatprep.subr.bf16.mxu1 %v2379_v1  ;;  %1857 = vmatprep.subr.bf16.mxu0 %v2379_v1 }
  0x70   :  { %1835 = vmatmul.mubr.msk.f32.vlgmr.msra.gmra.mrb[0].mxu1 %vm100_vm1, %v91_v16 }
  0x71   :  { %1838 = vmatpush3.bf16.msra.mxu1 %v2060_v17  ;;  %1845 = vmatprep.mubr.msk.bf16.mxu1 %vm2378_vm0, %v2379_v1 }
  0x72   :  { %1839 = vmatprep.subr.bf16.mxu1 %v2379_v1  ;;  %1858 = vmatpush3.bf16.msra.mxu0 %v2068_v24  ;;  %v2099_v24 = vld [vmem:[#allocation5 + $0x158] sm:$0xff]  }
  0x73   :  { %1859 = vmatprep.subr.bf16.mxu0 %v2379_v1 }
  0x75   :  { %1840 = vmatpush3.bf16.msra.mxu1 %v2061_v18 }
  0x76   :  { %1841 = vmatprep.subr.bf16.mxu1 %v2379_v1  ;;  %1860 = vmatpush3.bf16.msra.mxu0 %v2069_v25  ;;  %v2100_v25 = vld [vmem:[#allocation5 + $0x160] sm:$0xff]  }
  0x77   :  { %1861 = vmatprep.subr.bf16.mxu0 %v2379_v1 }
  0x79   :  { %1842 = vmatpush3.bf16.msra.mxu1 %v2062_v19  ;;  %v2094_v19 = vld [vmem:[#allocation5 + $0x130] sm:$0xff]  }
  0x7a   :  { %1843 = vmatprep.subr.bf16.mxu1 %v2379_v1  ;;  %1862 = vmatpush3.bf16.msra.mxu0 %v2070_v26  ;;  %v2101_v26 = vld [vmem:[#allocation5 + $0x168] sm:$0xff]  }
  0x7b   :  { %1863 = vmatprep.subr.bf16.mxu0 %v2379_v1 }
  0x7d   :  { %1844 = vmatpush3.bf16.msra.mxu1 %v2063_v20  ;;  %v2095_v20 = vld [vmem:[#allocation5 + $0x138] sm:$0xff]  }
  0x7e   :  { %1869 = vmatprep.subr.bf16.mxu1 %v2379_v1  ;;  %1864 = vmatpush3.bf16.msra.mxu0 %v2071_v27  ;;  %v2102_v27 = vld [vmem:[#allocation5 + $0x170] sm:$0xff]  }
  0x7f   :  { %1889 = vmatprep.subr.bf16.mxu0 %v2379_v1 }
  0x80   :  { %1846 = vmatmul.mubr.msk.bf16.vlgmr.msra.gmra.mrb[4].mxu1 %vm100_vm1, %v188_v21  ;;  %v2096_v21 = vld [vmem:[#allocation5 + $0x140] sm:$0xff]  }
  0x81   :  { %1885 = vmatprep.mubr.msk.bf16.mxu1 %vm2378_vm0, %v2379_v1  ;;  %1870 = vmatpush3.bf16.msra.mxu1 %v2072_v28  ;;  %v503_v28 = vsub.s32 3, %v2515_v37 }
  0x82   :  { %1871 = vmatprep.subr.bf16.mxu1 %v2379_v1 }
  0x85   :  { %1872 = vmatpush3.bf16.msra.mxu1 %v2073_v29  ;;  %v504_v29 = vrot.slane %v2518_v39, %v503_v28  ;;  %v2126_v28 = vld [vmem:[#allocation5 + $0x230] sm:$0xff]  }
  0x86   :  { %1873 = vmatprep.subr.bf16.mxu1 %v2379_v1 }
  0x89   :  { %1874 = vmatpush3.bf16.msra.mxu1 %v2074_v30 }
  0x8a   :  { %1875 = vmatprep.subr.bf16.mxu1 %v2379_v1 }
  0x8d   :  { %1876 = vmatpush3.bf16.msra.mxu1 %v2075_v31 }
  0x8e   :  { %1877 = vmatprep.subr.bf16.mxu1 %v2379_v1 }
  0x91   :  { %1878 = vmatpush3.bf16.msra.mxu1 %v2076_v32 }
  0x92   :  { %1879 = vmatprep.subr.bf16.mxu1 %v2379_v1 }
  0x95   :  { %1880 = vmatpush3.bf16.msra.mxu1 %v2077_v33 }
  0x96   :  { %1881 = vmatprep.subr.bf16.mxu1 %v2379_v1 }
  0x99   :  { %1882 = vmatpush3.bf16.msra.mxu1 %v2078_v48 }
  0x9a   :  { %1883 = vmatprep.subr.bf16.mxu1 %v2379_v1 }
  0x9d   :  { %1884 = vmatpush3.bf16.msra.mxu1 %v2079_v49 }
  0x9e   :  { %1909 = vmatprep.subr.bf16.mxu1 %v2379_v1 }
 0x143   :  { %v170_v34 = vpop.f32.mrb[0].mxu1 }
 0x144   :  { %174 = vst [vmem:[#allocation12] sm:$0xff] %v170_v34  ;;  %v1836_v35 = vpop.f32.mrb[1].mxu1 }
 0x153   :  { %v254_v41 = vpop.f32.mrb[4].mxu1 }
 0x154   :  { %v255_v42 = vadd.f32 %v254_v41, %v192_v40  ;;  %v1847_v43 = vpop.f32.mrb[5].mxu1  ;;  %v2103_v40 = vld [vmem:[#allocation5 + $0x178] sm:$0xff]   ;;  %v2104_v41 = vld [vmem:[#allocation5 + $0x180] sm:$0xff]  }
 0x155   :  { %v257_v44 = vpop.f32.mrb[6].mxu1  ;;  %v2106_v43 = vld [vmem:[#allocation5 + $0x190] sm:$0xff]  }
 0x156   :  { %v260_v45 = vmax.f32 %v255_v42, 0.0  ;;  %v1848_v46 = vpop.f32.mrb[7].mxu1  ;;  %v2105_v42 = vld [vmem:[#allocation5 + $0x188] sm:$0xff]   ;;  %v2107_v44 = vld [vmem:[#allocation5 + $0x198] sm:$0xff]  }
 0x157   :  { %v2109_v46 = vld [vmem:[#allocation5 + $0x1a8] sm:$0xff]  }
 0x158   :  { %v261_v47 = vpack.c.bf16 %v260_v45, %v260_v45  ;;  %v2108_v45 = vld [vmem:[#allocation5 + $0x1a0] sm:$0xff]  }
 0x15a   :  { %1866 = vmatmul.mubr.bf16.vlgmr.msra.gmra.mrb[0].mxu0 %v261_v47  ;;  %v614_v47 = vsub.s32 4, %v2515_v37 }
 0x15b   :  { %1905 = vmatprep.mubr.msk.bf16.mxu0 %vm2378_vm0, %v2379_v1  ;;  %1890 = vmatpush3.bf16.msra.mxu0 %v2080_v50 }
 0x15c   :  { %1891 = vmatprep.subr.bf16.mxu0 %v2379_v1  ;;  %v615_v48 = vrot.slane %v2518_v39, %v614_v47 }
 0x15f   :  { %1892 = vmatpush3.bf16.msra.mxu0 %v2081_v51 }
 0x160   :  { %1893 = vmatprep.subr.bf16.mxu0 %v2379_v1 }
 0x163   :  { %1894 = vmatpush3.bf16.msra.mxu0 %v2082_v52 }
 0x164   :  { %1895 = vmatprep.subr.bf16.mxu0 %v2379_v1 }
 0x167   :  { %1896 = vmatpush3.bf16.msra.mxu0 %v2083_v53 }
 0x168   :  { %1897 = vmatprep.subr.bf16.mxu0 %v2379_v1 }
 0x16b   :  { %1898 = vmatpush3.bf16.msra.mxu0 %v2084_v54 }
 0x16c   :  { %1899 = vmatprep.subr.bf16.mxu0 %v2379_v1 }
 0x16f   :  { %1900 = vmatpush3.bf16.msra.mxu0 %v2085_v55  ;;  %v2110_v55 = vld [vmem:[#allocation5 + $0x1b0] sm:$0xff]  }
 0x170   :  { %1901 = vmatprep.subr.bf16.mxu0 %v2379_v1 }
 0x173   :  { %1902 = vmatpush3.bf16.msra.mxu0 %v2086_v2 }
 0x174   :  { %1903 = vmatprep.subr.bf16.mxu0 %v2379_v1 }
 0x177   :  { %1904 = vmatpush3.bf16.msra.mxu0 %v2087_v3 }
 0x178   :  { %1929 = vmatprep.subr.bf16.mxu0 %v2379_v1 }
 0x22d   :  { %v365_v58 = vpop.f32.mrb[0].mxu0 }
 0x22e   :  { %v366_v59 = vadd.f32 %v365_v58, %v282_v57  ;;  %v1867_v60 = vpop.f32.mrb[1].mxu0  ;;  %v2111_v57 = vld [vmem:[#allocation5 + $0x1b8] sm:$0xff]   ;;  %v2112_v58 = vld [vmem:[#allocation5 + $0x1c0] sm:$0xff]  }
 0x22f   :  { %v368_v61 = vpop.f32.mrb[2].mxu0  ;;  %v2114_v60 = vld [vmem:[#allocation5 + $0x1d0] sm:$0xff]  }
 0x230   :  { %v371_v62 = vmax.f32 %v366_v59, 0.0  ;;  %v1868_v63 = vpop.f32.mrb[3].mxu0  ;;  %v2113_v59 = vld [vmem:[#allocation5 + $0x1c8] sm:$0xff]   ;;  %v2115_v61 = vld [vmem:[#allocation5 + $0x1d8] sm:$0xff]  }
 0x231   :  { %v2117_v63 = vld [vmem:[#allocation5 + $0x1e8] sm:$0xff]  }
 0x232   :  { %v372_v0 = vpack.c.bf16 %v371_v62, %v371_v62  ;;  %v2116_v62 = vld [vmem:[#allocation5 + $0x1e0] sm:$0xff]  }
 0x234   :  { %1886 = vmatmul.mubr.bf16.vlgmr.msra.gmra.mrb[8].mxu1 %v372_v0  ;;  %v724_v0 = vsub.s32 5, %v2515_v37 }
 0x235   :  { %1925 = vmatprep.mubr.msk.bf16.mxu1 %vm2378_vm0, %v2379_v1  ;;  %1910 = vmatpush3.bf16.msra.mxu1 %v2088_v4 }
 0x236   :  { %1911 = vmatprep.subr.bf16.mxu1 %v2379_v1  ;;  %v725_v2 = vrot.slane %v2518_v39, %v724_v0  ;;  %v2612_v0 = vld [vmem:[#allocation8 + $0x20] sm:$0x7] }
 0x239   :  { %1912 = vmatpush3.bf16.msra.mxu1 %v2089_v5 }
 0x23a   :  { %1913 = vmatprep.subr.bf16.mxu1 %v2379_v1 }
 0x23d   :  { %1914 = vmatpush3.bf16.msra.mxu1 %v2090_v6 }
 0x23e   :  { %1915 = vmatprep.subr.bf16.mxu1 %v2379_v1 }
 0x241   :  { %1916 = vmatpush3.bf16.msra.mxu1 %v2091_v7 }
 0x242   :  { %1917 = vmatprep.subr.bf16.mxu1 %v2379_v1 }
 0x245   :  { %1918 = vmatpush3.bf16.msra.mxu1 %v2092_v8 }
 0x246   :  { %1919 = vmatprep.subr.bf16.mxu1 %v2379_v1 }
 0x249   :  { %1920 = vmatpush3.bf16.msra.mxu1 %v2093_v9 }
 0x24a   :  { %1921 = vmatprep.subr.bf16.mxu1 %v2379_v1 }
 0x24d   :  { %1922 = vmatpush3.bf16.msra.mxu1 %v2094_v19  ;;  %v835_v19 = vsub.s32 6, %v2515_v37 }
 0x24e   :  { %1923 = vmatprep.subr.bf16.mxu1 %v2379_v1 }
 0x251   :  { %1924 = vmatpush3.bf16.msra.mxu1 %v2095_v20  ;;  %v836_v20 = vrot.slane %v2518_v39, %v835_v19  ;;  %v2171_v19 = vld [vmem:[#allocation7 + $0xac] ss:$16 sps:$4 sm:$0xff]  }
 0x252   :  { %1949 = vmatprep.subr.bf16.mxu1 %v2379_v1 }
 0x307   :  { %v476_v12 = vpop.f32.mrb[8].mxu1 }
 0x308   :  { %v477_v13 = vadd.f32 %v476_v12, %v393_v11  ;;  %v1887_v14 = vpop.f32.mrb[9].mxu1  ;;  %v2118_v11 = vld [vmem:[#allocation5 + $0x1f0] sm:$0xff]   ;;  %v2119_v12 = vld [vmem:[#allocation5 + $0x1f8] sm:$0xff]  }
 0x309   :  { %v479_v15 = vpop.f32.mrb[10].mxu1  ;;  %v2121_v14 = vld [vmem:[#allocation5 + $0x208] sm:$0xff]  }
 0x30a   :  { %v482_v16 = vmax.f32 %v477_v13, 0.0  ;;  %v1888_v17 = vpop.f32.mrb[11].mxu1  ;;  %v2120_v13 = vld [vmem:[#allocation5 + $0x200] sm:$0xff]   ;;  %v2122_v15 = vld [vmem:[#allocation5 + $0x210] sm:$0xff]  }
 0x30b   :  { %v2124_v17 = vld [vmem:[#allocation5 + $0x220] sm:$0xff]  }
 0x30c   :  { %v483_v18 = vpack.c.bf16 %v482_v16, %v482_v16  ;;  %v2123_v16 = vld [vmem:[#allocation5 + $0x218] sm:$0xff]  }
 0x30e   :  { %1906 = vmatmul.mubr.bf16.vlgmr.msra.gmra.mrb[4].mxu0 %v483_v18  ;;  %v2125_v18 = vld [vmem:[#allocation5 + $0x228] sm:$0xff]  }
 0x30f   :  { %1945 = vmatprep.mubr.msk.bf16.mxu0 %vm2378_vm0, %v2379_v1  ;;  %1930 = vmatpush3.bf16.msra.mxu0 %v2096_v21 }
 0x310   :  { %1931 = vmatprep.subr.bf16.mxu0 %v2379_v1 }
 0x313   :  { %1932 = vmatpush3.bf16.msra.mxu0 %v2097_v22 }
 0x314   :  { %1933 = vmatprep.subr.bf16.mxu0 %v2379_v1 }
 0x317   :  { %1934 = vmatpush3.bf16.msra.mxu0 %v2098_v23 }
 0x318   :  { %1935 = vmatprep.subr.bf16.mxu0 %v2379_v1 }
 0x31b   :  { %1936 = vmatpush3.bf16.msra.mxu0 %v2099_v24 }
 0x31c   :  { %1937 = vmatprep.subr.bf16.mxu0 %v2379_v1 }
 0x31f   :  { %1938 = vmatpush3.bf16.msra.mxu0 %v2100_v25 }
 0x320   :  { %1939 = vmatprep.subr.bf16.mxu0 %v2379_v1 }
 0x323   :  { %1940 = vmatpush3.bf16.msra.mxu0 %v2101_v26 }
 0x324   :  { %1941 = vmatprep.subr.bf16.mxu0 %v2379_v1 }
 0x327   :  { %1942 = vmatpush3.bf16.msra.mxu0 %v2102_v27 }
 0x328   :  { %1943 = vmatprep.subr.bf16.mxu0 %v2379_v1 }
 0x32b   :  { %1944 = vmatpush3.bf16.msra.mxu0 %v2103_v40 }
 0x32c   :  { %1969 = vmatprep.subr.bf16.mxu0 %v2379_v1 }
 0x3e1   :  { %v587_v30 = vpop.f32.mrb[4].mxu0 }
 0x3e2   :  { %v588_v31 = vadd.f32 %v587_v30, %v504_v29  ;;  %v1907_v32 = vpop.f32.mrb[5].mxu0  ;;  %v2127_v29 = vld [vmem:[#allocation5 + $0x238] sm:$0xff]   ;;  %v2128_v30 = vld [vmem:[#allocation5 + $0x240] sm:$0xff]  }
 0x3e3   :  { %v590_v33 = vpop.f32.mrb[6].mxu0  ;;  %v2130_v32 = vld [vmem:[#allocation5 + $0x250] sm:$0xff]  }
 0x3e4   :  { %v593_v34 = vmax.f32 %v588_v31, 0.0  ;;  %v1908_v35 = vpop.f32.mrb[7].mxu0  ;;  %v2129_v31 = vld [vmem:[#allocation5 + $0x248] sm:$0xff]   ;;  %v2131_v33 = vld [vmem:[#allocation5 + $0x258] sm:$0xff]  }
 0x3e5   :  { %v2133_v35 = vld [vmem:[#allocation5 + $0x268] sm:$0xff]  }
 0x3e6   :  { %v594_v36 = vpack.c.bf16 %v593_v34, %v593_v34  ;;  %v2132_v34 = vld [vmem:[#allocation5 + $0x260] sm:$0xff]  }
 0x3e8   :  { %1926 = vmatmul.mubr.bf16.vlgmr.msra.gmra.mrb[12].mxu1 %v594_v36  ;;  %v946_v36 = vsub.s32 7, %v2515_v37 }
 0x3e9   :  { %1965 = vmatprep.mubr.msk.bf16.mxu1 %vm2378_vm0, %v2379_v1  ;;  %1950 = vmatpush3.bf16.msra.mxu1 %v2104_v41 }
 0x3ea   :  { %1951 = vmatprep.subr.bf16.mxu1 %v2379_v1  ;;  %v947_v40 = vrot.slane %v2518_v39, %v946_v36  ;;  %v2142_v39 = vld [vmem:[#allocation7 + $0x20] ss:$16 sps:$4 sm:$0xff]  }
 0x3ed   :  { %1952 = vmatpush3.bf16.msra.mxu1 %v2105_v42 }
 0x3ee   :  { %1953 = vmatprep.subr.bf16.mxu1 %v2379_v1 }
 0x3f1   :  { %1954 = vmatpush3.bf16.msra.mxu1 %v2106_v43 }
 0x3f2   :  { %1955 = vmatprep.subr.bf16.mxu1 %v2379_v1 }
 0x3f5   :  { %1956 = vmatpush3.bf16.msra.mxu1 %v2107_v44 }
 0x3f6   :  { %1957 = vmatprep.subr.bf16.mxu1 %v2379_v1 }
 0x3f9   :  { %1958 = vmatpush3.bf16.msra.mxu1 %v2108_v45 }
 0x3fa   :  { %1959 = vmatprep.subr.bf16.mxu1 %v2379_v1 }
 0x3fd   :  { %1960 = vmatpush3.bf16.msra.mxu1 %v2109_v46 }
 0x3fe   :  { %1961 = vmatprep.subr.bf16.mxu1 %v2379_v1 }
 0x401   :  { %1962 = vmatpush3.bf16.msra.mxu1 %v2110_v55  ;;  %v2148_v55 = vld [vmem:[#allocation7 + $0x40] ss:$16 sps:$4 sm:$0xff]  }
 0x402   :  { %1963 = vmatprep.subr.bf16.mxu1 %v2379_v1 }
 0x405   :  { %1964 = vmatpush3.bf16.msra.mxu1 %v2111_v57  ;;  %v2156_v57 = vld [vmem:[#allocation7 + $0x64] ss:$16 sps:$4 sm:$0xff]  }
 0x406   :  { %1989 = vmatprep.subr.bf16.mxu1 %v2379_v1 }
 0x4bb   :  { %v698_v49 = vpop.f32.mrb[12].mxu1 }
 0x4bc   :  { %v699_v50 = vadd.f32 %v698_v49, %v615_v48  ;;  %v1927_v51 = vpop.f32.mrb[13].mxu1  ;;  %v2134_v48 = vld [vmem:[#allocation5 + $0x270] sm:$0xff]   ;;  %v2135_v49 = vld [vmem:[#allocation5 + $0x278] sm:$0xff]  }
 0x4bd   :  { %v701_v52 = vpop.f32.mrb[14].mxu1  ;;  %v2138_v51 = vld [vmem:[#allocation7 + $0x4] ss:$16 sps:$4 sm:$0xff]  }
 0x4be   :  { %v704_v53 = vpack.c.bf16 %v699_v50, %v699_v50  ;;  %v1928_v54 = vpop.f32.mrb[15].mxu1  ;;  %v2136_v50 = vld [vmem:[#allocation7] ss:$16 sps:$4 sm:$0xff]   ;;  %v2141_v52 = vld [vmem:[#allocation7 + $0xc] ss:$16 sps:$4 sm:$0xff]  }
 0x4bf   :  { %v2150_v54 = vld [vmem:[#allocation7 + $0x44] ss:$16 sps:$4 sm:$0xff]  }
 0x4c0   :  { %1946 = vmatmul.mubr.bf16.vlgmr.msra.gmra.mrb[8].mxu0 %v704_v53  ;;  %v2144_v53 = vld [vmem:[#allocation7 + $0x24] ss:$16 sps:$4 sm:$0xff]  }
 0x4c1   :  { %1985 = vmatprep.mubr.msk.bf16.mxu0 %vm2378_vm0, %v2379_v1  ;;  %1970 = vmatpush3.bf16.msra.mxu0 %v2112_v58  ;;  %v2154_v58 = vld [vmem:[#allocation7 + $0x60] ss:$16 sps:$4 sm:$0xff]  }
 0x4c2   :  { %1971 = vmatprep.subr.bf16.mxu0 %v2379_v1 }
 0x4c5   :  { %1972 = vmatpush3.bf16.msra.mxu0 %v2113_v59  ;;  %v2160_v59 = vld [vmem:[#allocation7 + $0x80] ss:$16 sps:$4 sm:$0xff]  }
 0x4c6   :  { %1973 = vmatprep.subr.bf16.mxu0 %v2379_v1 }
 0x4c9   :  { %1974 = vmatpush3.bf16.msra.mxu0 %v2114_v60  ;;  %v2168_v60 = vld [vmem:[#allocation7 + $0xa4] ss:$16 sps:$4 sm:$0xff]  }
 0x4ca   :  { %1975 = vmatprep.subr.bf16.mxu0 %v2379_v1 }
 0x4cd   :  { %1976 = vmatpush3.bf16.msra.mxu0 %v2115_v61  ;;  %v2166_v61 = vld [vmem:[#allocation7 + $0xa0] ss:$16 sps:$4 sm:$0xff]  }
 0x4ce   :  { %1977 = vmatprep.subr.bf16.mxu0 %v2379_v1 }
 0x4d1   :  { %1978 = vmatpush3.bf16.msra.mxu0 %v2116_v62  ;;  %v2174_v62 = vld [vmem:[#allocation7 + $0xc4] ss:$16 sps:$4 sm:$0xff]  }
 0x4d2   :  { %1979 = vmatprep.subr.bf16.mxu0 %v2379_v1 }
 0x4d5   :  { %1980 = vmatpush3.bf16.msra.mxu0 %v2117_v63  ;;  %v2172_v63 = vld [vmem:[#allocation7 + $0xc0] ss:$16 sps:$4 sm:$0xff]  }
 0x4d6   :  { %1981 = vmatprep.subr.bf16.mxu0 %v2379_v1 }
 0x4d9   :  { %1982 = vmatpush3.bf16.msra.mxu0 %v2118_v11 }
 0x4da   :  { %1983 = vmatprep.subr.bf16.mxu0 %v2379_v1 }
 0x4dd   :  { %1984 = vmatpush3.bf16.msra.mxu0 %v2119_v12  ;;  %v2147_v12 = vld [vmem:[#allocation7 + $0x2c] ss:$16 sps:$4 sm:$0xff]  }
 0x4de   :  { %2009 = vmatprep.subr.bf16.mxu0 %v2379_v1 }
 0x593   :  { %v808_v3 = vpop.f32.mrb[8].mxu0 }
 0x594   :  { %v809_v4 = vadd.f32 %v808_v3, %v725_v2  ;;  %v1947_v5 = vpop.f32.mrb[9].mxu0  ;;  %v1058_v2 = vrot.slane %v2612_v0, %v191_v38  ;;  %v2157_v38 = vld [vmem:[#allocation7 + $0x68] ss:$16 sps:$4 sm:$0xff]  }
 0x595   :  { %v811_v6 = vpop.f32.mrb[10].mxu0 }
 0x596   :  { %v814_v7 = vmax.f32 %v809_v4, 0.0  ;;  %v1948_v8 = vpop.f32.mrb[11].mxu0 }
 0x598   :  { %v815_v9 = vpack.c.bf16 %v814_v7, %v814_v7 }
 0x59a   :  { %1966 = vmatmul.mubr.bf16.vlgmr.msra.gmra.mrb[16].mxu1 %v815_v9  ;;  %v2139_v9 = vld [vmem:[#allocation7 + $0x8] ss:$16 sps:$4 sm:$0xff]  }
 0x59b   :  { %2005 = vmatprep.mubr.msk.bf16.mxu1 %vm2378_vm0, %v2379_v1  ;;  %1990 = vmatpush3.bf16.msra.mxu1 %v2120_v13  ;;  %v2145_v13 = vld [vmem:[#allocation7 + $0x28] ss:$16 sps:$4 sm:$0xff]  }
 0x59c   :  { %1991 = vmatprep.subr.bf16.mxu1 %v2379_v1 }
 0x59f   :  { %1992 = vmatpush3.bf16.msra.mxu1 %v2121_v14  ;;  %v2153_v14 = vld [vmem:[#allocation7 + $0x4c] ss:$16 sps:$4 sm:$0xff]  }
 0x5a0   :  { %1993 = vmatprep.subr.bf16.mxu1 %v2379_v1 }
 0x5a3   :  { %1994 = vmatpush3.bf16.msra.mxu1 %v2122_v15  ;;  %v2151_v15 = vld [vmem:[#allocation7 + $0x48] ss:$16 sps:$4 sm:$0xff]  }
 0x5a4   :  { %1995 = vmatprep.subr.bf16.mxu1 %v2379_v1 }
 0x5a7   :  { %1996 = vmatpush3.bf16.msra.mxu1 %v2123_v16  ;;  %v2159_v16 = vld [vmem:[#allocation7 + $0x6c] ss:$16 sps:$4 sm:$0xff]  }
 0x5a8   :  { %1997 = vmatprep.subr.bf16.mxu1 %v2379_v1 }
 0x5ab   :  { %1998 = vmatpush3.bf16.msra.mxu1 %v2124_v17  ;;  %v2165_v17 = vld [vmem:[#allocation7 + $0x8c] ss:$16 sps:$4 sm:$0xff]  }
 0x5ac   :  { %1999 = vmatprep.subr.bf16.mxu1 %v2379_v1 }
 0x5af   :  { %2000 = vmatpush3.bf16.msra.mxu1 %v2125_v18  ;;  %v2163_v18 = vld [vmem:[#allocation7 + $0x88] ss:$16 sps:$4 sm:$0xff]  }
 0x5b0   :  { %2001 = vmatprep.subr.bf16.mxu1 %v2379_v1 }
 0x5b3   :  { %2002 = vmatpush3.bf16.msra.mxu1 %v2126_v28  ;;  %v1169_v28 = vrot.slane %v2612_v0, %v281_v56 }
 0x5b4   :  { %2003 = vmatprep.subr.bf16.mxu1 %v2379_v1 }
 0x5b7   :  { %2004 = vmatpush3.bf16.msra.mxu1 %v2127_v29 }
 0x5b8   :  { %1468 = vmatprep.subr.bf16.mxu1 %v2138_v51 }
 0x66d   :  { %v919_v21 = vpop.f32.mrb[16].mxu1 }
 0x66e   :  { %v920_v22 = vadd.f32 %v919_v21, %v836_v20  ;;  %v1967_v23 = vpop.f32.mrb[17].mxu1  ;;  %v2169_v20 = vld [vmem:[#allocation7 + $0xa8] ss:$16 sps:$4 sm:$0xff]   ;;  %v2177_v21 = vld [vmem:[#allocation7 + $0xcc] ss:$16 sps:$4 sm:$0xff]  }
 0x66f   :  { %v922_v24 = vpop.f32.mrb[18].mxu1  ;;  %v2180_v23 = vld [vmem:[#allocation7 + $0xe4] ss:$16 sps:$4 sm:$0xff]  }
 0x670   :  { %v925_v25 = vmax.f32 %v920_v22, 0.0  ;;  %v1968_v26 = vpop.f32.mrb[19].mxu1  ;;  %v2175_v22 = vld [vmem:[#allocation7 + $0xc8] ss:$16 sps:$4 sm:$0xff]   ;;  %v2183_v24 = vld [vmem:[#allocation7 + $0xec] ss:$16 sps:$4 sm:$0xff]  }
 0x671   :  { %v2181_v26 = vld [vmem:[#allocation7 + $0xe8] ss:$16 sps:$4 sm:$0xff]  }
 0x672   :  { %v926_v27 = vpack.c.bf16 %v925_v25, %v925_v25  ;;  %v2178_v25 = vld [vmem:[#allocation7 + $0xe0] ss:$16 sps:$4 sm:$0xff]  }
 0x674   :  { %1986 = vmatmul.mubr.bf16.vlgmr.msra.gmra.mrb[12].mxu0 %v926_v27  ;;  %v2380_v27 = vmov 0  }
 0x675   :  { %2025 = vmatprep.mubr.msk.bf16.mxu0 %vm2378_vm0, %v2379_v1  ;;  %2010 = vmatpush3.bf16.msra.mxu0 %v2128_v30 }
 0x676   :  { %2011 = vmatprep.subr.bf16.mxu0 %v2379_v1 }
 0x679   :  { %2012 = vmatpush3.bf16.msra.mxu0 %v2129_v31 }
 0x67a   :  { %2013 = vmatprep.subr.bf16.mxu0 %v2379_v1 }
 0x67d   :  { %2014 = vmatpush3.bf16.msra.mxu0 %v2130_v32 }
 0x67e   :  { %2015 = vmatprep.subr.bf16.mxu0 %v2379_v1 }
 0x681   :  { %2016 = vmatpush3.bf16.msra.mxu0 %v2131_v33 }
 0x682   :  { %2017 = vmatprep.subr.bf16.mxu0 %v2379_v1 }
 0x685   :  { %2018 = vmatpush3.bf16.msra.mxu0 %v2132_v34 }
 0x686   :  { %2019 = vmatprep.subr.bf16.mxu0 %v2379_v1 }
 0x689   :  { %2020 = vmatpush3.bf16.msra.mxu0 %v2133_v35 }
 0x68a   :  { %2021 = vmatprep.subr.bf16.mxu0 %v2379_v1 }
 0x68d   :  { %2022 = vmatpush3.bf16.msra.mxu0 %v2134_v48 }
 0x68e   :  { %2023 = vmatprep.subr.bf16.mxu0 %v2379_v1  ;;  %v2162_v1 = vld [vmem:[#allocation7 + $0x84] ss:$16 sps:$4 sm:$0xff]  }
 0x691   :  { %2024 = vmatpush3.bf16.msra.mxu0 %v2135_v49 }
 0x692   :  { %1509 = vmatprep.subr.bf16.mxu0 %v2141_v52 }
 0x747   :  { %v1030_v41 = vpop.f32.mrb[12].mxu0 }
 0x748   :  { %v1031_v42 = vadd.f32 %v1030_v41, %v947_v40  ;;  %v1987_v43 = vpop.f32.mrb[13].mxu0 }
 0x749   :  { %v1033_v44 = vpop.f32.mrb[14].mxu0 }
 0x74a   :  { %v1036_v45 = vmax.f32 %v1031_v42, 0.0  ;;  %v1988_v46 = vpop.f32.mrb[15].mxu0 }
 0x74c   :  { %v1037_v47 = vpack.c.bf16 %v1036_v45, %v1036_v45 }
 0x74e   :  { %2006 = vmatmul.mubr.bf16.vlgmr.msra.gmra.mrb[20].mxu1 %v1037_v47 }
 0x74f   :  { %1469 = vmatpush1.bf16.msra.mxu1 %v2136_v50  ;;  %1500 = vmatprep.mubr.bf16.mxu1 %v2380_v27 }
 0x750   :  { %1470 = vmatprep.subr.bf16.mxu1 %v2144_v53 }
 0x753   :  { %1471 = vmatpush1.bf16.msra.mxu1 %v2142_v39 }
 0x754   :  { %1472 = vmatprep.subr.bf16.mxu1 %v2150_v54 }
 0x757   :  { %1473 = vmatpush1.bf16.msra.mxu1 %v2148_v55 }
 0x758   :  { %1474 = vmatprep.subr.bf16.mxu1 %v2156_v57 }
 0x75b   :  { %1475 = vmatpush1.bf16.msra.mxu1 %v2154_v58 }
 0x75c   :  { %1476 = vmatprep.subr.bf16.mxu1 %v2162_v1 }
 0x75f   :  { %1477 = vmatpush1.bf16.msra.mxu1 %v2160_v59 }
 0x760   :  { %1478 = vmatprep.subr.bf16.mxu1 %v2168_v60 }
 0x763   :  { %1479 = vmatpush1.bf16.msra.mxu1 %v2166_v61 }
 0x764   :  { %1480 = vmatprep.subr.bf16.mxu1 %v2174_v62 }
 0x767   :  { %1481 = vmatpush1.bf16.msra.mxu1 %v2172_v63 }
 0x768   :  { %1482 = vmatprep.subr.bf16.mxu1 %v2180_v23 }
 0x76b   :  { %1483 = vmatpush1.bf16.msra.mxu1 %v2178_v25 }
 0x821   :  { %v1141_v3 = vpop.f32.mrb[20].mxu1 }
 0x822   :  { %v1142_v4 = vadd.f32 %v1141_v3, %v1058_v2  ;;  %v2007_v5 = vpop.f32.mrb[21].mxu1 }
 0x823   :  { %v1144_v6 = vpop.f32.mrb[22].mxu1 }
 0x824   :  { %v1147_v7 = vmax.f32 %v1142_v4, 0.0  ;;  %v2008_v8 = vpop.f32.mrb[23].mxu1 }
 0x826   :  { %v1148_v11 = vpack.c.bf16 %v1147_v7, %v1147_v7 }
 0x828   :  { %2026 = vmatmul.mubr.bf16.vlgmr.msra.gmra.mrb[16].mxu0 %v1148_v11 }
 0x829   :  { %1510 = vmatpush1.bf16.msra.mxu0 %v2139_v9  ;;  %1541 = vmatprep.mubr.bf16.mxu0 %v2380_v27 }
 0x82a   :  { %1511 = vmatprep.subr.bf16.mxu0 %v2147_v12 }
 0x82d   :  { %1512 = vmatpush1.bf16.msra.mxu0 %v2145_v13 }
 0x82e   :  { %1513 = vmatprep.subr.bf16.mxu0 %v2153_v14 }
 0x831   :  { %1514 = vmatpush1.bf16.msra.mxu0 %v2151_v15 }
 0x832   :  { %1515 = vmatprep.subr.bf16.mxu0 %v2159_v16 }
 0x835   :  { %1516 = vmatpush1.bf16.msra.mxu0 %v2157_v38 }
 0x836   :  { %1517 = vmatprep.subr.bf16.mxu0 %v2165_v17 }
 0x839   :  { %1518 = vmatpush1.bf16.msra.mxu0 %v2163_v18 }
 0x83a   :  { %1519 = vmatprep.subr.bf16.mxu0 %v2171_v19 }
 0x83d   :  { %1520 = vmatpush1.bf16.msra.mxu0 %v2169_v20 }
 0x83e   :  { %1521 = vmatprep.subr.bf16.mxu0 %v2177_v21 }
 0x841   :  { %1522 = vmatpush1.bf16.msra.mxu0 %v2175_v22 }
 0x842   :  { %1523 = vmatprep.subr.bf16.mxu0 %v2183_v24 }
 0x845   :  { %1524 = vmatpush1.bf16.msra.mxu0 %v2181_v26 }
 0x8fb   :  { %v1252_v29 = vpop.f32.mrb[16].mxu0 }
 0x8fc   :  { %v1253_v30 = vadd.f32 %v1252_v29, %v1169_v28  ;;  %v2027_v31 = vpop.f32.mrb[17].mxu0 }
 0x8fd   :  { %v1255_v32 = vpop.f32.mrb[18].mxu0 }
 0x8fe   :  { %v1258_v33 = vmax.f32 %v1253_v30, 0.0  ;;  %v2028_v34 = vpop.f32.mrb[19].mxu0 }
 0x900   :  { %v1259_v35 = vpack.c.bf16 %v1258_v33, %v1258_v33 }
 0x902   :  { %1501 = vmatmul.mubr.bf16.vlgmr.msra.gmra.mrb[24].mxu1 %v1259_v35  ;;  %1542 = vmatmul.mubr.bf16.vlgmr.msra.gmra.mrb[20].mxu0 %v1259_v35 }
 0x903   :  { %2321 = shalt.err (!%p2318_p2)
}
 0x904   :  { %s2322_s15 = scalar_lea.hbm %s2655_s6, 128 }
 0x905   :  { %p2323_p3 = scmp.ne.s32.totalorder %s2655_s6, %s2322_s15  ;;  %p2326_p4 = scmp.lt.u32.totalorder %s2322_s15, %s2655_s6 }
 0x907   :  { %p2328_p5 = pnand %p2326_p4, %p2323_p3 }
 0x909   :  { %2331 = shalt.err (!%p2328_p5)
}
 0x90a   :  { %1597 = dma.vmem_to_hbm [thread:$0]  %s1595_s11, 128, %s2655_s6, [#allocation13]   ;;  %v178_v37 = vld [vmem:[#allocation8 + $0x30] sm:$0x7]  ;;  %v177_v56 = vld [vmem:[#allocation8 + $0x28] sm:$0x7]  ;;  %v1295_v40 = vrot.slane %v2612_v0, %v2548_v10 }
 0x90b   :  { %v179_v36 = vld [vmem:[#allocation8 + $0x38] sm:$0x7]  ;;  %v1303_v41 = vrot.slane %v178_v37, %v2548_v10  ;;  %v1299_v42 = vrot.slane %v177_v56, %v2548_v10  ;;  %s2382_s6 = smov [#allocation11]  }
 0x90c   :  { %v1307_v43 = vrot.slane %v179_v36, %v2548_v10  ;;  %s1584_s1 = sshll.u32 %s2382_s6, 4  ;;  %s1585_s1 = int_to_ptr.vmem [resolvable:$true] %s1584_s1 }
 0x90d   :  { %s2332_s21 = scalar_lea.vmem %s1585_s1, 512  ;;  %p2337_p7 = scmp.lt.s32.totalorder %s1585_s1, %s1585_s1 }
 0x90e   :  { %p2333_p6 = scmp.ne.s32.totalorder %s1585_s1, %s2332_s21  ;;  %p2338_p8 = scmp.lt.s32.totalorder %s2332_s21, %s2332_s21 }
 0x910   :  { %p2339_p9 = por %p2338_p8, %p2337_p7 }
 0x912   :  { %p2340_p10 = pnand %p2339_p9, %p2333_p6 }
 0x9d5   :  { %v1502_v44 = vpop.f32.mrb[24].mxu1  ;;  %v1543_v45 = vpop.f32.mrb[20].mxu0 }
 0x9d6   :  { %v1503_v46 = vadd.f32 %v1502_v44, %v1295_v40  ;;  %v1544_v47 = vadd.f32 %v1543_v45, %v1303_v41  ;;  %v1504_v48 = vpop.f32.mrb[25].mxu1  ;;  %v1545_v49 = vpop.f32.mrb[21].mxu0 }
 0x9d7   :  { %v1505_v50 = vadd.f32 %v1504_v48, %v1299_v42  ;;  %v1546_v51 = vadd.f32 %v1545_v49, %v1307_v43  ;;  %v1506_v52 = vpop.f32.mrb[26].mxu1  ;;  %v1547_v53 = vpop.f32.mrb[22].mxu0 }
 0x9d8   :  { %v1719_v39 = vmul.f32 -1.442695, %v1503_v46  ;;  %v1721_v54 = vmul.f32 -1.442695, %v1544_v47  ;;  %v1507_v55 = vpop.f32.mrb[27].mxu1  ;;  %v1548_v57 = vpop.f32.mrb[23].mxu0 }
 0x9d9   :  { %v1720_v58 = vmul.f32 -1.442695, %v1505_v50  ;;  %v1722_v1 = vmul.f32 -1.442695, %v1546_v51 }
 0x9da   :  { %2184 = vpow2.f32 %v1719_v39 }
 0x9db   :  { %2186 = vpow2.f32 %v1721_v54 }
 0x9dc   :  { %2188 = vpow2.f32 %v1720_v58 }
 0x9dd   :  { %2190 = vpow2.f32 %v1722_v1 }
 0x9e4   :  { %v2185_v10 = vpop.eup %2184 }
 0x9e5   :  { %v2187_v59 = vpop.eup %2186  ;;  %v1562_v60 = vadd.f32 1.0, %v2185_v10 }
 0x9e6   :  { %v2189_v61 = vpop.eup %2188  ;;  %v1564_v62 = vadd.f32 1.0, %v2187_v59 }
 0x9e7   :  { %v2191_v63 = vpop.eup %2190  ;;  %2192 = vrcp.f32 %v1562_v60  ;;  %v1563_v0 = vadd.f32 1.0, %v2189_v61 }
 0x9e8   :  { %2194 = vrcp.f32 %v1564_v62  ;;  %v1565_v2 = vadd.f32 1.0, %v2191_v63 }
 0x9e9   :  { %2196 = vrcp.f32 %v1563_v0 }
 0x9ea   :  { %2198 = vrcp.f32 %v1565_v2 }
 0x9f1   :  { %v2193_v3 = vpop.eup %2192 }
 0x9f2   :  { %v2195_v4 = vpop.eup %2194  ;;  %1574 = vst [vmem:[#allocation11] sm:$0xff] %v2193_v3 }
 0x9f3   :  { %v2197_v5 = vpop.eup %2196  ;;  %1576 = vst [vmem:[#allocation11 + $0x10] sm:$0xff] %v2195_v4 }
 0x9f4   :  { %v2199_v6 = vpop.eup %2198  ;;  %1575 = vst [vmem:[#allocation11 + $0x8] sm:$0xff] %v2197_v5 }
 0x9f5   :  { %1577 = vst [vmem:[#allocation11 + $0x18] sm:$0xff] %v2199_v6 }
 0x9f6   :  { %2343 = shalt.err (!%p2340_p10)
}
 0x9f7   :  { %s2344_s24 = scalar_lea.hbm %s2654_s5, 512 }
 0x9f8   :  { %p2345_p11 = scmp.ne.s32.totalorder %s2654_s5, %s2344_s24  ;;  %p2348_p12 = scmp.lt.u32.totalorder %s2344_s24, %s2654_s5 }
 0x9fa   :  { %p2350_p13 = pnand %p2348_p12, %p2345_p11 }
 0x9fc   :  { %2353 = shalt.err (!%p2350_p13)
}
 0x9fd   :  { %1587 = dma.vmem_to_hbm [thread:$0]  %s1585_s1, 512, %s2654_s5, [#allocation4]  }
 0x9fe   :  { %2360 = dma.done.wait [#allocation4], 512  }
 0x9ff   :  { %2361 = vsyncadd [#allocation4], 4294966784 }
 0xa00   :  { %2362 = dma.done.wait [#allocation13], 128  }
 0xa01   :  { %2363 = vsyncadd [#allocation13], 4294967168 }
 0xa02   :  { %1604 = vsyncpa [#allocation3], 1 }
 0xa03   :  { %1605 = vsyncpa [#allocation6], 1 }
 0xa04   :  { %1606 = vsyncpa [#allocation9], 1 }
 0xa05   :  { %1607 = vsyncpa [#allocation4], 1 }
 0xa06   :  { %1608 = vsyncpa [#allocation13], 1 }

</bundles_post_ra>
